<compile_context>
chip_gen: v6e
topology: v6e:2x2x1
jax: 0.10.0
libtpu: 0.0.40
codegen_flags: <defaults>
</compile_context>

<pallas_src>
import functools
import math

import jax
import jax.numpy as jnp
from jax import lax
from jax.experimental import pallas as pl
from jax.experimental.pallas import tpu as pltpu


_MASK_VALUE = -1e30  # large finite negative (avoids -inf - -inf = NaN pitfalls)
_VMEM_LIMIT_BYTES = 32 * 1024 * 1024  # <= default on v6e/v7x, raises v5e's 16MiB


# --------------------------- tile-size selection -----------------------------

def _pick_tile(dim, target, quantum):
    """Largest tile <= target that divides `dim` and is a multiple of `quantum`.

    Falls back to the full dimension, which is always a legal TPU block size.
    """
    if dim <= target:
        return dim
    t = (target // quantum) * quantum
    while t >= quantum:
        if dim % t == 0:
            return t
        t -= quantum
    return dim


# ------------------------------ linear kernel --------------------------------

def _linear_kernel(x_ref, w_ref, b_ref, o_ref, acc_ref):
    k = pl.program_id(2)

    @pl.when(k == 0)
    def _init():
        # Fold the bias into the f32 accumulator init; keeps the finalize
        # epilogue (the un-hidden part of the pipeline) shorter.
        acc_ref[...] = jnp.broadcast_to(
            b_ref[...].astype(jnp.float32), acc_ref.shape
        )

    acc_ref[...] += jnp.dot(
        x_ref[...], w_ref[...], preferred_element_type=jnp.float32
    )

    @pl.when(k == pl.num_programs(2) - 1)
    def _finalize():
        o_ref[...] = acc_ref[...].astype(o_ref.dtype)


def pallas_linear(x, w, b, *, tm_target=512, tn_target=512, tk_target=256):
    """x: (M, K), w: (K, N), b: (N,) -> (M, N)  (tiled, pipelined GEMM)."""
    M, K = x.shape
    K2, N = w.shape
    assert K == K2 and b.shape == (N,)

    tm = _pick_tile(M, tm_target, 8)
    tn = _pick_tile(N, tn_target, 128)
    tk = _pick_tile(K, tk_target, 128)
    grid = (M // tm, N // tn, K // tk)

    return pl.pallas_call(
        _linear_kernel,
        out_shape=jax.ShapeDtypeStruct((M, N), x.dtype),
        grid=grid,
        in_specs=[
            pl.BlockSpec((tm, tk), lambda i, j, k: (i, k)),
            pl.BlockSpec((tk, tn), lambda i, j, k: (k, j)),
            pl.BlockSpec((1, tn), lambda i, j, k: (0, j)),
        ],
        out_specs=pl.BlockSpec((tm, tn), lambda i, j, k: (i, j)),
        scratch_shapes=[pltpu.VMEM((tm, tn), jnp.float32)],
        compiler_params=pltpu.CompilerParams(
            dimension_semantics=("parallel", "parallel", "arbitrary"),
            vmem_limit_bytes=_VMEM_LIMIT_BYTES,
        ),
    )(x, w, b.reshape(1, N))


# --------------------------- flash attention kernel --------------------------

def _flash_attn_kernel(q_ref, k_ref, v_ref, o_ref, m_sc, l_sc, acc_sc, *,
                       scale, tq, tkv, hp, hd, q_off, k_off, v_off,
                       approx_recip):
    # grid = (B*G, T//tq, T//tkv); each step handles `hp` packed heads.
    qi = pl.program_id(1)
    ki = pl.program_id(2)

    q_first = qi * tq
    q_last = q_first + (tq - 1)
    k_first = ki * tkv
    k_last = k_first + (tkv - 1)

    @pl.when(ki == 0)
    def _init():
        m_sc[...] = jnp.full_like(m_sc, _MASK_VALUE)
        l_sc[...] = jnp.zeros_like(l_sc)
        acc_sc[...] = jnp.zeros_like(acc_sc)

    def _accumulate(apply_mask):
        q_all = q_ref[0]                       # (tq,  Wq)
        k_all = k_ref[0]                       # (tkv, Wk)
        v_all = v_ref[0]                       # (tkv, Wv)

        if apply_mask:
            # block-local causal mask, shared across the packed heads
            row = q_first + lax.broadcasted_iota(jnp.int32, (tq, tkv), 0)
            col = k_first + lax.broadcasted_iota(jnp.int32, (tq, tkv), 1)
            visible = col <= row

        for h in range(hp):                    # static unroll over packed heads
            q = q_all[:, q_off + h * hd:q_off + (h + 1) * hd]   # (tq,  hd)
            k = k_all[:, k_off + h * hd:k_off + (h + 1) * hd]   # (tkv, hd)
            v = v_all[:, v_off + h * hd:v_off + (h + 1) * hd]   # (tkv, hd)

            # QK^T: contract the hd axis of both operands directly on the MXU.
            s = lax.dot_general(
                q, k, (((1,), (1,)), ((), ())),
                preferred_element_type=jnp.float32,
            ) * scale                           # (tq, tkv) f32

            if apply_mask:
                s = jnp.where(visible, s, _MASK_VALUE)

            m_prev = m_sc[h]                    # (tq, 1)
            m_new = jnp.maximum(m_prev, jnp.max(s, axis=-1, keepdims=True))
            alpha = jnp.exp(m_prev - m_new)     # (tq, 1)
            p = jnp.exp(s - m_new)              # (tq, tkv) f32

            l_sc[h] = alpha * l_sc[h] + jnp.sum(p, axis=-1, keepdims=True)
            acc_sc[h] = alpha * acc_sc[h] + jnp.dot(
                p.astype(v.dtype), v, preferred_element_type=jnp.float32
            )
            m_sc[h] = m_new

    # Causal block skipping:
    #   fully-visible blocks  (k_last <= q_first)    -> compute, no mask
    #   diagonal-band blocks  (overlap the diagonal) -> compute with mask
    #   fully-masked blocks   (k_first > q_last)     -> no compute; their DMA is
    #     also elided because the kv index_map clamps to the last visible block.
    @pl.when(k_last <= q_first)
    def _full_block():
        _accumulate(apply_mask=False)

    @pl.when(jnp.logical_and(k_first <= q_last, k_last > q_first))
    def _diag_block():
        _accumulate(apply_mask=True)

    @pl.when(ki == pl.num_programs(2) - 1)
    def _finalize():
        outs = []
        for h in range(hp):
            inv = pl.reciprocal(l_sc[h], approx=approx_recip)
            outs.append(acc_sc[h] * inv)
        o = outs[0] if hp == 1 else jnp.concatenate(outs, axis=-1)
        o_ref[0] = o.astype(o_ref.dtype)        # single lane-dense store


def pallas_causal_attention_fused(qkv, n_head, *, tq_target=128, tkv_target=128):
    """qkv: (B, T, 3*C) fused projection -> (B, T, C) causal attention output.

    Reads q/k/v head-groups straight out of the fused qkv tensor and writes the
    already head-merged (B, T, C) output, so no XLA split/merge transposes are
    needed around the kernel.
    """
    B, T, threeC = qkv.shape
    assert threeC % 3 == 0
    C = threeC // 3
    assert C % n_head == 0
    hd = C // n_head

    tq = _pick_tile(T, tq_target, 128)
    tkv = _pick_tile(T, tkv_target, 128)
    n_q = T // tq
    n_kv = T // tkv

    def kv_clamp(qi, ki):
        # Fully-masked kv blocks repeat the last visible block index so their
        # HBM->VMEM copy is elided (their compute is skipped in the kernel).
        return jnp.minimum(ki, ((qi + 1) * tq - 1) // tkv)

    if C % 128 == 0:
        # Lane-dense main path: pack `hp` heads per block so the minor block
        # dim is a multiple of 128 lanes.  hp is the smallest divisor of H with
        # hp*hd % 128 == 0 (guaranteed to exist since C % 128 == 0).
        hp = next(d for d in range(1, n_head + 1)
                  if n_head % d == 0 and (d * hd) % 128 == 0)
        G = n_head // hp
        P = hp * hd
        grid = (B * G, n_q, n_kv)

        q_spec = pl.BlockSpec((1, tq, P),
                              lambda n, qi, ki: (n // G, qi, n % G))
        k_spec = pl.BlockSpec(
            (1, tkv, P),
            lambda n, qi, ki: (n // G, kv_clamp(qi, ki), G + n % G))
        v_spec = pl.BlockSpec(
            (1, tkv, P),
            lambda n, qi, ki: (n // G, kv_clamp(qi, ki), 2 * G + n % G))
        o_spec = pl.BlockSpec((1, tq, P),
                              lambda n, qi, ki: (n // G, qi, n % G))
        q_off = k_off = v_off = 0
    else:
        # Fallback for tiny models (C not a multiple of 128): DMA full
        # (tq/tkv, 3C) rows (legal because the block spans the full minor dim)
        # and slice q/k/v columns inside the kernel.  Redundant DMA, but this
        # path only exists for small correctness configs.
        hp = n_head
        G = 1
        grid = (B, n_q, n_kv)
        q_spec = pl.BlockSpec((1, tq, threeC),
                              lambda n, qi, ki: (n, qi, 0))
        k_spec = pl.BlockSpec((1, tkv, threeC),
                              lambda n, qi, ki: (n, kv_clamp(qi, ki), 0))
        v_spec = k_spec
        o_spec = pl.BlockSpec((1, tq, C), lambda n, qi, ki: (n, qi, 0))
        q_off, k_off, v_off = 0, C, 2 * C

    kernel = functools.partial(
        _flash_attn_kernel,
        scale=1.0 / math.sqrt(hd), tq=tq, tkv=tkv, hp=hp, hd=hd,
        q_off=q_off, k_off=k_off, v_off=v_off,
        approx_recip=(jnp.dtype(qkv.dtype) != jnp.dtype(jnp.float32)),
    )

    return pl.pallas_call(
        kernel,
        out_shape=jax.ShapeDtypeStruct((B, T, C), qkv.dtype),
        grid=grid,
        in_specs=[q_spec, k_spec, v_spec],
        out_specs=o_spec,
        scratch_shapes=[
            pltpu.VMEM((hp, tq, 1), jnp.float32),    # running max  m (per head)
            pltpu.VMEM((hp, tq, 1), jnp.float32),    # running sum  l (per head)
            pltpu.VMEM((hp, tq, hd), jnp.float32),   # running acc  (unnormalized O)
        ],
        compiler_params=pltpu.CompilerParams(
            dimension_semantics=("parallel", "parallel", "arbitrary"),
            vmem_limit_bytes=_VMEM_LIMIT_BYTES,
        ),
    )(qkv, qkv, qkv)


# -------------------------------- forward ------------------------------------

def causal_self_attention(x, params, n_head, *, compute_dtype=jnp.bfloat16):
    """Forward pass equivalent to the PyTorch CausalSelfAttention module.

    compute_dtype=bfloat16 runs all matmul operands / HBM activations in bf16
    (f32 MXU accumulation, f32 softmax statistics).  Pass jnp.float32 for a
    bit-faithful reference path.
    """
    B, T, C = x.shape
    assert C % n_head == 0
    cd = jnp.dtype(compute_dtype)

    x2 = x.reshape(B * T, C).astype(cd)
    w_attn = params["w_attn"].astype(cd)
    w_proj = params["w_proj"].astype(cd)
    b_attn = params["b_attn"].astype(jnp.float32)  # added in the f32 accumulator
    b_proj = params["b_proj"].astype(jnp.float32)

    # fused qkv projection (tiled GEMM); (B*T, 3C) -> free view as (B, T, 3C)
    qkv = pallas_linear(x2, w_attn, b_attn).reshape(B, T, 3 * C)

    # causal flash attention reading q/k/v straight from the fused layout and
    # writing the merged-head (B, T, C) output (no XLA transposes / HBM passes)
    y = pallas_causal_attention_fused(qkv, n_head)

    # output projection
    y = pallas_linear(y.reshape(B * T, C), w_proj, b_proj)
    return y.reshape(B, T, C).astype(x.dtype)


# ------------------------------- reference ------------------------------------

def reference_attention(x, params, n_head):
    hi = jax.lax.Precision.HIGHEST
    B, T, C = x.shape
    hd = C // n_head
    qkv = jnp.dot(x.reshape(B * T, C), params["w_attn"], precision=hi)
    qkv = qkv + params["b_attn"]
    qkv = qkv.reshape(B, T, 3 * C)
    q, k, v = jnp.split(qkv, 3, axis=-1)
    q = q.reshape(B, T, n_head, hd).transpose(0, 2, 1, 3)
    k = k.reshape(B, T, n_head, hd).transpose(0, 2, 1, 3)
    v = v.reshape(B, T, n_head, hd).transpose(0, 2, 1, 3)
    att = jnp.einsum("bhqd,bhkd->bhqk", q, k, precision=hi) / math.sqrt(hd)
    mask = jnp.tril(jnp.ones((T, T), dtype=bool))
    att = jnp.where(mask[None, None], att, -jnp.inf)
    att = jax.nn.softmax(att, axis=-1)
    y = jnp.einsum("bhqk,bhkd->bhqd", att, v, precision=hi)
    y = y.transpose(0, 2, 1, 3).reshape(B * T, C)
    y = jnp.dot(y, params["w_proj"], precision=hi) + params["b_proj"]
    return y.reshape(B, T, C)


# ---------------------------------- main --------------------------------------

if __name__ == "__main__":
    def make_case(case_key, batch, seq, emb):
        k_x, k_wa, k_ba, k_wp, k_bp = jax.random.split(case_key, 5)
        x = jax.random.normal(k_x, (batch, seq, emb), dtype=jnp.float32)
        params = {
            # stored as (in_features, out_features); equivalent to PyTorch W.T
            "w_attn": 0.02 * jax.random.normal(k_wa, (emb, 3 * emb), dtype=jnp.float32),
            "b_attn": 0.02 * jax.random.normal(k_ba, (3 * emb,), dtype=jnp.float32),
            "w_proj": 0.02 * jax.random.normal(k_wp, (emb, emb), dtype=jnp.float32),
            "b_proj": 0.02 * jax.random.normal(k_bp, (emb,), dtype=jnp.float32),
        }
        return x, params

    key = jax.random.PRNGKey(0)
    key_small, key_med = jax.random.split(key)

    # Small config consistent with the module (n_embed=32, n_head=4, seq=8,
    # batch=2); exercises the fallback (C % 128 != 0) attention path.
    x, params = make_case(key_small, batch=2, seq=8, emb=32)
    ref = reference_attention(x, params, 4)

    out = jax.block_until_ready(
        causal_self_attention(x, params, 4, compute_dtype=jnp.float32))
    assert out.shape == (2, 8, 32)
    assert jnp.allclose(out, ref, atol=2e-4, rtol=2e-3), "f32 mismatch (small)"

    out = jax.block_until_ready(
        causal_self_attention(x, params, 4, compute_dtype=jnp.bfloat16))
    assert jnp.allclose(out, ref, atol=2.5e-2, rtol=2.5e-2), "bf16 mismatch (small)"

    # Medium config: exercises the lane-dense head-packed path (hd=64, hp=2),
    # the tiled GEMM grid, the flash kv loop and causal KV-DMA skipping.
    x, params = make_case(key_med, batch=2, seq=256, emb=256)
    ref = reference_attention(x, params, 4)

    out = jax.block_until_ready(
        causal_self_attention(x, params, 4, compute_dtype=jnp.float32))
    assert out.shape == (2, 256, 256)
    assert jnp.allclose(out, ref, atol=2e-4, rtol=2e-3), "f32 mismatch (medium)"

    out = jax.block_until_ready(
        causal_self_attention(x, params, 4, compute_dtype=jnp.bfloat16))
    assert jnp.allclose(out, ref, atol=2.5e-2, rtol=2.5e-2), "bf16 mismatch (medium)"

    print("KERNEL_OK")
</pallas_src>

<mosaic_0001>
module attributes {stable_mosaic.version = 11 : i64} {
  func.func @_linear_kernel(%arg0: i32, %arg1: i32, %arg2: i32, %arg3: memref<16x32xf32, #tpu.memory_space<vmem>>, %arg4: memref<32x96xf32, #tpu.memory_space<vmem>>, %arg5: memref<1x96xf32, #tpu.memory_space<vmem>>, %arg6: memref<16x96xf32, #tpu.memory_space<vmem>>, %arg7: memref<16x96xf32, #tpu.memory_space<vmem>>) attributes {dimension_semantics = [#tpu.dimension_semantics<parallel>, #tpu.dimension_semantics<parallel>, #tpu.dimension_semantics<arbitrary>], iteration_bounds = array<i64: 1, 1, 1>, scalar_prefetch = 0 : i64, scratch_operands = 1 : i64, tpu.core_type = #tpu.core_type<tc>, window_params = [{transform_indices = @transform_0, window_bounds = array<i64: 16, 32>}, {transform_indices = @transform_1, window_bounds = array<i64: 32, 96>}, {transform_indices = @transform_2, window_bounds = array<i64: 1, 96>}, {transform_indices = @transform_3, window_bounds = array<i64: 16, 96>}]} {
    %c0_i32 = arith.constant 0 : i32
    %0 = arith.cmpi eq, %arg2, %c0_i32 : i32
    %1 = arith.extui %0 : i1 to i32
    %c0_i32_0 = arith.constant 0 : i32
    %2 = arith.cmpi ne, %1, %c0_i32_0 : i32
    scf.if %2 {
      %c0_10 = arith.constant 0 : index
      %c0_11 = arith.constant 0 : index
      %12 = vector.load %arg5[%c0_10, %c0_11] : memref<1x96xf32, #tpu.memory_space<vmem>>, vector<1x96xf32>
      %13 = vector.shape_cast %12 : vector<1x96xf32> to vector<1x96xf32>
      %14 = vector.broadcast %13 : vector<1x96xf32> to vector<16x96xf32>
      %c0_12 = arith.constant 0 : index
      %c0_13 = arith.constant 0 : index
      %15 = vector.load %arg7[%c0_12, %c0_13] : memref<16x96xf32, #tpu.memory_space<vmem>>, vector<16x96xf32>
      tpu.vector_store %arg7[%c0_12, %c0_13], %14 {strides = array<i32>} : memref<16x96xf32, #tpu.memory_space<vmem>>, vector<16x96xf32>,
    } else {
    }
    %c0 = arith.constant 0 : index
    %c0_1 = arith.constant 0 : index
    %3 = vector.load %arg7[%c0, %c0_1] : memref<16x96xf32, #tpu.memory_space<vmem>>, vector<16x96xf32>
    %c0_2 = arith.constant 0 : index
    %c0_3 = arith.constant 0 : index
    %4 = vector.load %arg3[%c0_2, %c0_3] : memref<16x32xf32, #tpu.memory_space<vmem>>, vector<16x32xf32>
    %c0_4 = arith.constant 0 : index
    %c0_5 = arith.constant 0 : index
    %5 = vector.load %arg4[%c0_4, %c0_5] : memref<32x96xf32, #tpu.memory_space<vmem>>, vector<32x96xf32>
    %cst = arith.constant dense<0.000000e+00> : vector<16x96xf32>
    %6 = tpu.matmul %4, %5, %cst {dimension_numbers = #tpu.dot_dimension_numbers<[1], [0], [0], [1], [0, 0, 1, 1], [], []>} : vector<16x32xf32>, vector<32x96xf32>, vector<16x96xf32> -> vector<16x96xf32>
    %7 = arith.addf %3, %6 : vector<16x96xf32>
    %c0_6 = arith.constant 0 : index
    %c0_7 = arith.constant 0 : index
    %8 = vector.load %arg7[%c0_6, %c0_7] : memref<16x96xf32, #tpu.memory_space<vmem>>, vector<16x96xf32>
    tpu.vector_store %arg7[%c0_6, %c0_7], %7 {strides = array<i32>} : memref<16x96xf32, #tpu.memory_space<vmem>>, vector<16x96xf32>,
    %c0_i32_8 = arith.constant 0 : i32
    %9 = arith.cmpi eq, %arg2, %c0_i32_8 : i32
    %10 = arith.extui %9 : i1 to i32
    %c0_i32_9 = arith.constant 0 : i32
    %11 = arith.cmpi ne, %10, %c0_i32_9 : i32
    scf.if %11 {
      %c0_10 = arith.constant 0 : index
      %c0_11 = arith.constant 0 : index
      %12 = vector.load %arg7[%c0_10, %c0_11] : memref<16x96xf32, #tpu.memory_space<vmem>>, vector<16x96xf32>
      %c0_12 = arith.constant 0 : index
      %c0_13 = arith.constant 0 : index
      %13 = vector.load %arg6[%c0_12, %c0_13] : memref<16x96xf32, #tpu.memory_space<vmem>>, vector<16x96xf32>
      tpu.vector_store %arg6[%c0_12, %c0_13], %12 {strides = array<i32>} : memref<16x96xf32, #tpu.memory_space<vmem>>, vector<16x96xf32>,
    } else {
    }
    return
  }
  func.func @transform_0(%arg0: i32, %arg1: i32, %arg2: i32) -> (i32, i32) {
    %c0_i32 = arith.constant 0 : i32
    return %arg0, %arg2 : i32, i32
  }
  func.func @transform_1(%arg0: i32, %arg1: i32, %arg2: i32) -> (i32, i32) {
    %c0_i32 = arith.constant 0 : i32
    return %arg2, %arg1 : i32, i32
  }
  func.func @transform_2(%arg0: i32, %arg1: i32, %arg2: i32) -> (i32, i32) {
    %c0_i32 = arith.constant 0 : i32
    %c0_i32_0 = arith.constant 0 : i32
    return %c0_i32, %arg1 : i32, i32
  }
  func.func @transform_3(%arg0: i32, %arg1: i32, %arg2: i32) -> (i32, i32) {
    %c0_i32 = arith.constant 0 : i32
    return %arg0, %arg1 : i32, i32
  }
}

</mosaic_0001>

<bundles_post_ra>
// kernel: tpu_custom_call.1
= control target key start
LH: loop header
LB: loop body
LE: loop exit
PB: predicated region body
PF: predicated region fallthrough
CT: control target
= control target key end

     0   :  { %8 = vsyncpa [#allocation4], 0  ;;  %s322_s0 = inlined_call_operand.hbm [shape: f32[16,32], index: 0, kind: input, shape index: {}]   ;;  %s323_s1 = inlined_call_operand.hbm [shape: f32[32,96], index: 1, kind: input, shape index: {}]   ;;  %s324_s2 = inlined_call_operand.vmem [shape: f32[1,96], index: 2, kind: input, shape index: {}]   ;;  %s325_s3 = inlined_call_operand.hbm [shape: f32[16,96], index: 3, kind: output, shape index: {}]  }
   0x1   :  { %9 = vsyncpa [#allocation7], 0 }
   0x2   :  { %10 = vsyncpa [#allocation5], 0  ;;  %s268_s12 = smov [#allocation3]  }
   0x3   :  { %s16_s13 = sshll.u32 %s268_s12, 4  ;;  %s17_s13 = int_to_ptr.vmem [resolvable:$true] %s16_s13 }
   0x4   :  { %s210_s14 = scalar_lea.vmem %s17_s13, 256  ;;  %p215_p1 = scmp.lt.s32.totalorder %s17_s13, %s17_s13 }
   0x5   :  { %p211_p0 = scmp.ne.s32.totalorder %s17_s13, %s210_s14  ;;  %p216_p2 = scmp.lt.s32.totalorder %s210_s14, %s210_s14 }
   0x7   :  { %p217_p3 = por %p216_p2, %p215_p1 }
   0x9   :  { %p218_p4 = pnand %p217_p3, %p211_p0 }
   0xb   :  { %221 = shalt.err (!%p218_p4)
}
   0xc   :  { %s269_s15 = smov 128   ;;  %s270_s16 = smov 8  }
   0xd   :  { %22 = dma.hbm_to_vmem [thread:$0]  %s322_s0, 256, %s17_s13, [#allocation4], %s269_s15, %s269_s15, %s270_s16  }
   0xe   :  { %s271_s19 = smov [#allocation6]  }
   0xf   :  { %s28_s20 = sshll.u32 %s271_s19, 4  ;;  %s29_s20 = int_to_ptr.vmem [resolvable:$true] %s28_s20 }
  0x10   :  { %s230_s21 = scalar_lea.vmem %s29_s20, 512  ;;  %p235_p6 = scmp.lt.s32.totalorder %s29_s20, %s29_s20 }
  0x11   :  { %p231_p5 = scmp.ne.s32.totalorder %s29_s20, %s230_s21  ;;  %p236_p7 = scmp.lt.s32.totalorder %s230_s21, %s230_s21 }
  0x13   :  { %p237_p8 = por %p236_p7, %p235_p6 }
  0x15   :  { %p238_p9 = pnand %p237_p8, %p231_p5 }
  0x17   :  { %241 = shalt.err (!%p238_p9)
}
  0x18   :  { %34 = dma.hbm_to_vmem [thread:$0]  %s323_s1, 512, %s29_s20, [#allocation7], %s269_s15, %s269_s15, %s270_s16  }
  0x19   :  { %262 = dma.done.wait [#allocation4], 256  }
  0x1a   :  { %263 = vsyncadd [#allocation4], 4294967040 }
  0x1b   :  { %264 = dma.done.wait [#allocation7], 512  }
  0x1c   :  { %265 = vsyncadd [#allocation7], 4294966784  ;;  %vm65_vm0 = vcmask 261120   ;;  %v64_v0 = vld [vmem:[#allocation6 + $0x18] sm:$0xff]  ;;  %v63_v1 = vld [vmem:[#allocation6 + $0x10] sm:$0xff]  ;;  %vm54_vm1 = vcmask 785408  }
  0x1d   :  { %186 = vmatprep.subr.mxu0 %v64_v0  ;;  %v59_v2 = vld [vmem:[#allocation3] sm:$0xff]  ;;  %v62_v3 = vld [vmem:[#allocation6 + $0x8] sm:$0xff]  ;;  %v177_v4 = vld [vmem:[%s324_s2] ss:$0 sm:$0xff]  ;;  %s272_s1 = smov [#allocation8]  }
  0x1e   :  { %187 = vmatpush3.msra.mxu0 %v64_v0  ;;  %194 = vmatprep.mubr.msk.f32.mxu0 %vm65_vm0, %v59_v2  ;;  %56 = vst.msk [vmem:[#allocation2 + $0x8] sm:$0xff] %vm54_vm1, %v177_v4  ;;  %55 = vst.msk [vmem:[#allocation2] sm:$0xff] %vm54_vm1, %v177_v4  ;;  %v61_v5 = vld [vmem:[#allocation6] sm:$0xff]  ;;  %v60_v6 = vld [vmem:[#allocation3 + $0x8] sm:$0xff]  ;;  %s164_s2 = sshll.u32 %s272_s1, 4  ;;  %s165_s2 = int_to_ptr.vmem [resolvable:$true] %s164_s2 }
  0x1f   :  { %188 = vmatprep.subr.mxu0 %v63_v1  ;;  %s242_s25 = scalar_lea.vmem %s165_s2, 256  ;;  %p247_p11 = scmp.lt.s32.totalorder %s165_s2, %s165_s2 }
  0x20   :  { %189 = vmatpush3.msra.mxu0 %v63_v1  ;;  %p243_p10 = scmp.ne.s32.totalorder %s165_s2, %s242_s25  ;;  %p248_p12 = scmp.lt.s32.totalorder %s242_s25, %s242_s25 }
  0x21   :  { %190 = vmatprep.subr.mxu0 %v62_v3 }
  0x22   :  { %191 = vmatpush3.msra.mxu0 %v62_v3  ;;  %p249_p13 = por %p248_p12, %p247_p11 }
  0x23   :  { %192 = vmatprep.subr.mxu0 %v61_v5 }
  0x24   :  { %193 = vmatpush3.msra.mxu0 %v61_v5  ;;  %p250_p0 = pnand %p249_p13, %p243_p10 }
  0x25   :  { %195 = vmatmul.mubr.msk.f32.vlgmr.msra.gmra.mxu0 %vm65_vm0, %v60_v6  ;;  %v58_v7 = vld [vmem:[#allocation2 + $0x8] sm:$0xff]  ;;  %v57_v9 = vld [vmem:[#allocation2] sm:$0xff] }
  0xe5   :  { %v196_v8 = vpop.f32.mrf.mxu0 }
  0xe6   :  { %v148_v10 = vadd.f32 %v196_v8, %v58_v7 }
  0xe7   :  { %v138_v11 = vpop.f32.mrf.mxu0 }
  0xe8   :  { %151 = vst.msk [vmem:[#allocation2 + $0x8] sm:$0xff] %vm54_vm1, %v148_v10  ;;  %v147_v12 = vadd.f32 %v138_v11, %v57_v9 }
  0xea   :  { %150 = vst.msk [vmem:[#allocation2] sm:$0xff] %vm54_vm1, %v147_v12 }
  0xef   :  { %v156_v13 = vld [vmem:[#allocation2 + $0x8] sm:$0xff] }
  0xf0   :  { %158 = vst.msk [vmem:[#allocation8 + $0x8] sm:$0xff] %vm54_vm1, %v156_v13 }
  0xf1   :  { %v155_v14 = vld [vmem:[#allocation2] sm:$0xff] }
  0xf2   :  { %157 = vst.msk [vmem:[#allocation8] sm:$0xff] %vm54_vm1, %v155_v14 }
  0xf3   :  { %253 = shalt.err (!%p250_p0)
}
  0xf4   :  { %170 = dma.vmem_to_hbm [thread:$0]  %s165_s2, 256, %s325_s3, [#allocation5], %s269_s15, %s269_s15, %s270_s16  }
  0xf5   :  { %266 = dma.done.wait [#allocation5], 256  }
  0xf6   :  { %267 = vsyncadd [#allocation5], 4294967040 }
  0xf7   :  { %174 = vsyncpa [#allocation4], 1 }
  0xf8   :  { %175 = vsyncpa [#allocation7], 1 }
  0xf9   :  { %176 = vsyncpa [#allocation5], 1 }

</bundles_post_ra>
